<compile_context>
chip_gen: v6e
topology: v6e:2x2x1
jax: 0.10.0
libtpu: 0.0.40
codegen_flags: <defaults>
</compile_context>

<pallas_src>
import functools

import jax
import jax.numpy as jnp
from jax.experimental import pallas as pl
from jax.experimental.pallas import tpu as pltpu


def _round_up(a: int, b: int) -> int:
    return ((a + b - 1) // b) * b


def _sublane(dtype) -> int:
    """Minimum second-minor tile multiple for a dtype (8 f32, 16 bf16, 32 int8)."""
    return max(8, 32 // jnp.dtype(dtype).itemsize)


def _largest_tile(total: int, max_tile: int, step: int) -> int:
    """Largest multiple of `step` that divides `total` and is <= max_tile."""
    t = max((min(max_tile, total) // step) * step, step)
    while total % t:
        t -= step
    return t


def _pad_kn(d_model: int, n_vocab: int):
    """Shared (K, N)-only padding. Used by BOTH param prep and forward, so the
    padded parameter shapes can never drift from the forward-pass tiling."""
    return _round_up(d_model, 128), _round_up(n_vocab, 128)


# ---------------------------------------------------------------------------
# Kernels
# ---------------------------------------------------------------------------
def _generator_kernel_single_k(x_ref, w_ref, b_ref, o_ref):
    """K grid collapsed to one step: dot + bias straight to the output tile."""
    acc = jnp.dot(x_ref[...], w_ref[...], preferred_element_type=jnp.float32)
    o_ref[...] = (acc + b_ref[...].astype(jnp.float32)).astype(o_ref.dtype)


def _generator_kernel_multi_k(x_ref, w_ref, b_ref, o_ref, acc_ref):
    """Fallback for very large d_model: accumulate over the K grid axis."""
    k = pl.program_id(2)
    part = jnp.dot(x_ref[...], w_ref[...], preferred_element_type=jnp.float32)

    @pl.when(k == 0)
    def _():
        acc_ref[...] = part            # assign, not zero + accumulate

    @pl.when(k != 0)
    def _():
        acc_ref[...] += part

    @pl.when(k == pl.num_programs(2) - 1)
    def _():
        o_ref[...] = (acc_ref[...] + b_ref[...].astype(jnp.float32)).astype(
            o_ref.dtype
        )


# ---------------------------------------------------------------------------
# Parameter prep (one-time): transpose to (K, N), cast, pad to 128 multiples.
# ---------------------------------------------------------------------------
def prepare_generator_params(weight, bias, compute_dtype=jnp.bfloat16):
    """weight: [n_vocab, d_model] (nn.Linear layout), bias: [n_vocab]."""
    n_vocab, d_model = weight.shape
    K_pad, N_pad = _pad_kn(d_model, n_vocab)
    w_t = weight.T.astype(compute_dtype)                       # (K, N), once
    w_t = jnp.pad(w_t, ((0, K_pad - d_model), (0, N_pad - n_vocab)))
    b2d = jnp.pad(
        bias.astype(jnp.float32).reshape(1, n_vocab),
        ((0, 0), (0, N_pad - n_vocab)),
    )
    return w_t, b2d


# ---------------------------------------------------------------------------
# Forward
# ---------------------------------------------------------------------------
@functools.partial(
    jax.jit,
    static_argnames=(
        "n_vocab", "d_model", "compute_dtype",
        "tm_max", "tn_max", "tk_max", "tk_full_max",
    ),
)
def generator_forward(
    x, w_t_pad, b2d_pad, *, n_vocab: int, d_model: int,
    compute_dtype=jnp.bfloat16,
    tm_max: int = 512, tn_max: int = 1024,
    tk_max: int = 2048, tk_full_max: int = 4096,
):
    """x: [seq_len, batch, d_model] -> [seq_len, batch, n_vocab]."""
    seq_len, batch, _ = x.shape
    M = seq_len * batch
    K_pad, N_pad = _pad_kn(d_model, n_vocab)
    assert w_t_pad.shape == (K_pad, N_pad), (w_t_pad.shape, (K_pad, N_pad))
    assert b2d_pad.shape == (1, N_pad)

    sub = _sublane(compute_dtype)
    M_pad = _round_up(M, sub)                        # minimal M padding
    tm = _largest_tile(M_pad, tm_max, sub)           # divides M_pad
    tn = _largest_tile(N_pad, tn_max, 128)           # divides N_pad (no over-pad)
    tk = K_pad if K_pad <= tk_full_max else _largest_tile(K_pad, tk_max, 128)

    grid_m, grid_n, grid_k = M_pad // tm, N_pad // tn, K_pad // tk
    out_dtype = x.dtype

    x2d = x.reshape(M, d_model).astype(compute_dtype)
    if (M_pad, K_pad) != (M, d_model):
        x2d = jnp.pad(x2d, ((0, M_pad - M), (0, K_pad - d_model)))

    # Explicit VMEM budget (double-buffered tiles + optional f32 accumulator),
    # capped at 48 MiB so the same config also compiles on v7x (64 MiB VMEM).
    xb = jnp.dtype(compute_dtype).itemsize
    wb = jnp.dtype(w_t_pad.dtype).itemsize
    ob = jnp.dtype(out_dtype).itemsize
    est = 2 * (tm * tk * xb + tk * tn * wb + tn * 4 + tm * tn * ob)
    if grid_k > 1:
        est += tm * tn * 4
    vmem_limit = int(min(48 << 20, max(32 << 20, 2 * est)))

    if grid_k == 1:
        # Decode-like single weight pass over many vocab tiles: deepen the
        # weight pipeline to hide DMA jitter on the bandwidth-bound stream.
        if grid_m == 1 and grid_n >= 3:
            w_spec = pl.BlockSpec((tk, tn), lambda i, j: (0, j),
                                  pipeline_mode=pl.Buffered(3))
        else:
            w_spec = pl.BlockSpec((tk, tn), lambda i, j: (0, j))

        out2d = pl.pallas_call(
            _generator_kernel_single_k,
            out_shape=jax.ShapeDtypeStruct((M_pad, N_pad), out_dtype),
            grid_spec=pltpu.PrefetchScalarGridSpec(
                num_scalar_prefetch=0,
                grid=(grid_m, grid_n),
                in_specs=[
                    pl.BlockSpec((tm, tk), lambda i, j: (i, 0)),   # activations
                    w_spec,                                        # weight (K,N)
                    pl.BlockSpec((1, tn), lambda i, j: (0, j)),    # bias
                ],
                out_specs=pl.BlockSpec((tm, tn), lambda i, j: (i, j)),
            ),
            compiler_params=pltpu.CompilerParams(
                dimension_semantics=("parallel", "parallel"),
                vmem_limit_bytes=vmem_limit,
            ),
        )(x2d, w_t_pad, b2d_pad)
    else:
        out2d = pl.pallas_call(
            _generator_kernel_multi_k,
            out_shape=jax.ShapeDtypeStruct((M_pad, N_pad), out_dtype),
            grid_spec=pltpu.PrefetchScalarGridSpec(
                num_scalar_prefetch=0,
                grid=(grid_m, grid_n, grid_k),                     # K last
                in_specs=[
                    pl.BlockSpec((tm, tk), lambda i, j, k: (i, k)),
                    pl.BlockSpec((tk, tn), lambda i, j, k: (k, j)),
                    pl.BlockSpec((1, tn), lambda i, j, k: (0, j)),
                ],
                out_specs=pl.BlockSpec((tm, tn), lambda i, j, k: (i, j)),
                scratch_shapes=[pltpu.VMEM((tm, tn), jnp.float32)],
            ),
            compiler_params=pltpu.CompilerParams(
                dimension_semantics=("parallel", "parallel", "arbitrary"),
                vmem_limit_bytes=vmem_limit,
            ),
        )(x2d, w_t_pad, b2d_pad)

    if (M_pad, N_pad) != (M, n_vocab):
        out2d = out2d[:M, :n_vocab]
    return out2d.reshape(seq_len, batch, n_vocab)


# ---------------------------------------------------------------------------
# Self-test
# ---------------------------------------------------------------------------
if __name__ == "__main__":
    def ref_logits(x, weight, bias, cast_dtype=None):
        xw, ww = x, weight
        if cast_dtype is not None:
            xw = xw.astype(cast_dtype).astype(jnp.float32)
            ww = ww.astype(cast_dtype).astype(jnp.float32)
        return jnp.einsum("sbd,vd->sbv", xw, ww,
                          precision=jax.lax.Precision.HIGHEST) + bias

    def make_problem(key, seq_len, batch, d_model, n_vocab):
        kx, kw, kb = jax.random.split(key, 3)
        bound = 1.0 / (d_model ** 0.5)
        w = jax.random.uniform(kw, (n_vocab, d_model), jnp.float32, -bound, bound)
        b = jax.random.uniform(kb, (n_vocab,), jnp.float32, -bound, bound)
        x = jax.random.normal(kx, (seq_len, batch, d_model), jnp.float32)
        return x, w, b

    key = jax.random.PRNGKey(0)
    k1, k2, k3 = jax.random.split(key, 3)

    # --- Test 1: main shapes, bf16 MXU path, collapsed-K grid --------------
    seq_len, batch, d_model, n_vocab = 8, 2, 32, 64
    x, w, b = make_problem(k1, seq_len, batch, d_model, n_vocab)
    wt, b2 = prepare_generator_params(w, b)
    out = generator_forward(x, wt, b2, n_vocab=n_vocab, d_model=d_model)
    out = jax.block_until_ready(out)
    assert out.shape == (seq_len, batch, n_vocab)
    assert jnp.allclose(out, ref_logits(x, w, b, jnp.bfloat16), atol=1e-4, rtol=1e-4)
    assert jnp.allclose(out, ref_logits(x, w, b), atol=1e-1, rtol=1e-1)

    # f32 compute path: exact against the f32 reference.
    wt32, b232 = prepare_generator_params(w, b, compute_dtype=jnp.float32)
    out32 = generator_forward(x, wt32, b232, n_vocab=n_vocab, d_model=d_model,
                              compute_dtype=jnp.float32)
    out32 = jax.block_until_ready(out32)
    assert jnp.allclose(out32, ref_logits(x, w, b), atol=1e-5, rtol=1e-5)

    # --- Test 2: multi-K accumulator path + ragged M / N slicing -----------
    s2, b2_, d2, v2 = 4, 2, 256, 192
    x2, w2, bias2 = make_problem(k2, s2, b2_, d2, v2)
    wt2, bb2 = prepare_generator_params(w2, bias2)
    out2 = generator_forward(x2, wt2, bb2, n_vocab=v2, d_model=d2,
                             tk_full_max=128, tk_max=128)   # force 2 K steps
    out2 = jax.block_until_ready(out2)
    assert out2.shape == (s2, b2_, v2)
    assert jnp.allclose(out2, ref_logits(x2, w2, bias2, jnp.bfloat16),
                        atol=1e-4, rtol=1e-4)

    # --- Test 3: decode-like shape exercising pl.Buffered(3) weight stream -
    s3, b3_, d3, v3 = 1, 8, 64, 500
    x3, w3, bias3 = make_problem(k3, s3, b3_, d3, v3)
    wt3, bb3 = prepare_generator_params(w3, bias3)
    out3 = generator_forward(x3, wt3, bb3, n_vocab=v3, d_model=d3,
                             tn_max=128)                    # 4 vocab tiles
    out3 = jax.block_until_ready(out3)
    assert out3.shape == (s3, b3_, v3)
    assert jnp.allclose(out3, ref_logits(x3, w3, bias3, jnp.bfloat16),
                        atol=1e-4, rtol=1e-4)

    print("KERNEL_OK")
</pallas_src>

<mosaic_0001>
module attributes {stable_mosaic.version = 11 : i64} {
  func.func @_generator_kernel_single_k(%arg0: i32, %arg1: i32, %arg2: memref<16x128xbf16, #tpu.memory_space<vmem>>, %arg3: memref<128x128xbf16, #tpu.memory_space<vmem>>, %arg4: memref<1x128xf32, #tpu.memory_space<vmem>>, %arg5: memref<16x128xf32, #tpu.memory_space<vmem>>) attributes {dimension_semantics = [#tpu.dimension_semantics<parallel>, #tpu.dimension_semantics<parallel>], iteration_bounds = array<i64: 1, 1>, scalar_prefetch = 0 : i64, scratch_operands = 0 : i64, tpu.core_type = #tpu.core_type<tc>, window_params = [{transform_indices = @transform_0, window_bounds = array<i64: 16, 128>}, {transform_indices = @transform_1, window_bounds = array<i64: 128, 128>}, {transform_indices = @transform_2, window_bounds = array<i64: 1, 128>}, {transform_indices = @transform_3, window_bounds = array<i64: 16, 128>}]} {
    %c0 = arith.constant 0 : index
    %c0_0 = arith.constant 0 : index
    %0 = vector.load %arg2[%c0, %c0_0] : memref<16x128xbf16, #tpu.memory_space<vmem>>, vector<16x128xbf16>
    %c0_1 = arith.constant 0 : index
    %c0_2 = arith.constant 0 : index
    %1 = vector.load %arg3[%c0_1, %c0_2] : memref<128x128xbf16, #tpu.memory_space<vmem>>, vector<128x128xbf16>
    %cst = arith.constant dense<0.000000e+00> : vector<16x128xf32>
    %2 = tpu.matmul %0, %1, %cst {dimension_numbers = #tpu.dot_dimension_numbers<[1], [0], [0], [1], [0, 0, 1, 1], [], []>} : vector<16x128xbf16>, vector<128x128xbf16>, vector<16x128xf32> -> vector<16x128xf32>
    %c0_3 = arith.constant 0 : index
    %c0_4 = arith.constant 0 : index
    %3 = vector.load %arg4[%c0_3, %c0_4] : memref<1x128xf32, #tpu.memory_space<vmem>>, vector<1x128xf32>
    %4 = vector.broadcast %3 : vector<1x128xf32> to vector<16x128xf32>
    %5 = arith.addf %2, %4 : vector<16x128xf32>
    %c0_5 = arith.constant 0 : index
    %c0_6 = arith.constant 0 : index
    %6 = vector.load %arg5[%c0_5, %c0_6] : memref<16x128xf32, #tpu.memory_space<vmem>>, vector<16x128xf32>
    tpu.vector_store %arg5[%c0_5, %c0_6], %5 {strides = array<i32>} : memref<16x128xf32, #tpu.memory_space<vmem>>, vector<16x128xf32>,
    return
  }
  func.func @transform_0(%arg0: i32, %arg1: i32) -> (i32, i32) {
    %c0_i32 = arith.constant 0 : i32
    %c0_i32_0 = arith.constant 0 : i32
    return %arg0, %c0_i32 : i32, i32
  }
  func.func @transform_1(%arg0: i32, %arg1: i32) -> (i32, i32) {
    %c0_i32 = arith.constant 0 : i32
    %c0_i32_0 = arith.constant 0 : i32
    return %c0_i32, %arg1 : i32, i32
  }
  func.func @transform_2(%arg0: i32, %arg1: i32) -> (i32, i32) {
    %c0_i32 = arith.constant 0 : i32
    %c0_i32_0 = arith.constant 0 : i32
    return %c0_i32, %arg1 : i32, i32
  }
  func.func @transform_3(%arg0: i32, %arg1: i32) -> (i32, i32) {
    %c0_i32 = arith.constant 0 : i32
    return %arg0, %arg1 : i32, i32
  }
}

</mosaic_0001>

<bundles_post_ra>
// kernel: generator_forward.1
= control target key start
LH: loop header
LB: loop body
LE: loop exit
PB: predicated region body
PF: predicated region fallthrough
CT: control target
= control target key end

     0   :  { %8 = vsyncpa [#allocation3], 0  ;;  %s309_s0 = inlined_call_operand.vmem [shape: bf16[16,128], index: 0, kind: input, shape index: {}]   ;;  %s310_s1 = inlined_call_operand.hbm [shape: bf16[128,128], index: 1, kind: input, shape index: {}]   ;;  %s311_s2 = inlined_call_operand.vmem [shape: f32[1,128], index: 2, kind: input, shape index: {}]   ;;  %s312_s3 = inlined_call_operand.hbm [shape: f32[16,128], index: 3, kind: output, shape index: {}]  }
   0x1   :  { %9 = vsyncpa [#allocation4], 0  ;;  %s269_s12 = smov [#allocation2]  }
   0x2   :  { %s17_s13 = sshll.u32 %s269_s12, 4  ;;  %s18_s13 = int_to_ptr.vmem [resolvable:$true] %s17_s13 }
   0x3   :  { %s233_s14 = scalar_lea.vmem %s18_s13, 1024  ;;  %p238_p1 = scmp.lt.s32.totalorder %s18_s13, %s18_s13 }
   0x4   :  { %p234_p0 = scmp.ne.s32.totalorder %s18_s13, %s233_s14  ;;  %p239_p2 = scmp.lt.s32.totalorder %s233_s14, %s233_s14 }
   0x6   :  { %p240_p3 = por %p239_p2, %p238_p1 }
   0x8   :  { %p241_p4 = pnand %p240_p3, %p234_p0 }
   0xa   :  { %244 = shalt.err (!%p241_p4)
}
   0xb   :  { %s270_s15 = smov 64   ;;  %s271_s16 = smov 4  }
   0xc   :  { %23 = dma.hbm_to_vmem [thread:$0]  %s310_s1, 1024, %s18_s13, [#allocation3], %s270_s15, %s270_s15, %s271_s16  }
   0xd   :  { %265 = dma.done.wait [#allocation3], 1024  }
   0xe   :  { %266 = vsyncadd [#allocation3], 4294966272  ;;  %v272_v0 = vmov 0.0   ;;  %vm273_vm0 = vmmov 0   ;;  %v216_v1 = vld [vmem:[#allocation2 + $0x38] sm:$0xff]   ;;  %v217_v2 = vld [vmem:[#allocation2 + $0x30] sm:$0xff]  }
   0xf   :  { %188 = vmatprep.subr.bf16.mxu0 %v272_v0  ;;  %204 = vmatprep.mubr.msk.bf16.mxu0 %vm273_vm0, %v272_v0  ;;  %v218_v3 = vld [vmem:[#allocation2 + $0x28] sm:$0xff]   ;;  %v219_v4 = vld [vmem:[#allocation2 + $0x20] sm:$0xff]   ;;  %v220_v5 = vld [vmem:[#allocation2 + $0x18] sm:$0xff]   ;;  %s274_s22 = smov [#allocation5]  }
  0x10   :  { %189 = vmatpush3.bf16.msra.mxu0 %v216_v1  ;;  %v221_v6 = vld [vmem:[#allocation2 + $0x10] sm:$0xff]   ;;  %v222_v7 = vld [vmem:[#allocation2 + $0x8] sm:$0xff]   ;;  %v223_v8 = vld [vmem:[#allocation2] sm:$0xff]   ;;  %s157_s23 = sshll.u32 %s274_s22, 4  ;;  %s158_s23 = int_to_ptr.vmem [resolvable:$true] %s157_s23 }
  0x11   :  { %190 = vmatprep.subr.bf16.mxu0 %v272_v0  ;;  %v224_v9 = vld [vmem:[%s309_s0] sm:$0xff]   ;;  %s245_s24 = scalar_lea.vmem %s158_s23, 256  ;;  %p250_p6 = scmp.lt.s32.totalorder %s158_s23, %s158_s23 }
  0x12   :  { %v169_v10 = vld [vmem:[%s311_s2] ss:$0 sm:$0xff]  ;;  %p246_p5 = scmp.ne.s32.totalorder %s158_s23, %s245_s24  ;;  %p251_p7 = scmp.lt.s32.totalorder %s245_s24, %s245_s24 }
  0x14   :  { %191 = vmatpush3.bf16.msra.mxu0 %v217_v2  ;;  %p252_p8 = por %p251_p7, %p250_p6 }
  0x15   :  { %192 = vmatprep.subr.bf16.mxu0 %v272_v0 }
  0x16   :  { %p253_p9 = pnand %p252_p8, %p246_p5 }
  0x18   :  { %193 = vmatpush3.bf16.msra.mxu0 %v218_v3 }
  0x19   :  { %194 = vmatprep.subr.bf16.mxu0 %v272_v0 }
  0x1c   :  { %195 = vmatpush3.bf16.msra.mxu0 %v219_v4 }
  0x1d   :  { %196 = vmatprep.subr.bf16.mxu0 %v272_v0 }
  0x20   :  { %197 = vmatpush3.bf16.msra.mxu0 %v220_v5 }
  0x21   :  { %198 = vmatprep.subr.bf16.mxu0 %v272_v0 }
  0x24   :  { %199 = vmatpush3.bf16.msra.mxu0 %v221_v6 }
  0x25   :  { %200 = vmatprep.subr.bf16.mxu0 %v272_v0 }
  0x28   :  { %201 = vmatpush3.bf16.msra.mxu0 %v222_v7 }
  0x29   :  { %202 = vmatprep.subr.bf16.mxu0 %v272_v0 }
  0x2c   :  { %203 = vmatpush3.bf16.msra.mxu0 %v223_v8 }
  0x2f   :  { %205 = vmatmul.mubr.bf16.vlgmr.msra.gmra.mxu0 %v224_v9 }
  0xef   :  { %v143_v11 = vpop.f32.mrf.mxu0 }
  0xf0   :  { %v144_v12 = vadd.f32 %v169_v10, %v143_v11 }
  0xf1   :  { %v206_v13 = vpop.f32.mrf.mxu0 }
  0xf2   :  { %150 = vst [vmem:[#allocation5] sm:$0xff] %v144_v12 }
  0xf3   :  { %v146_v14 = vpop.f32.mrf.mxu0 }
  0xf4   :  { %v147_v15 = vadd.f32 %v169_v10, %v146_v14 }
  0xf5   :  { %v207_v16 = vpop.f32.mrf.mxu0 }
  0xf6   :  { %151 = vst [vmem:[#allocation5 + $0x8] sm:$0xff] %v147_v15 }
  0xf7   :  { %256 = shalt.err (!%p253_p9)
}
  0xf8   :  { %s275_s0 = smov 128   ;;  %s276_s2 = smov 8  }
  0xf9   :  { %163 = dma.vmem_to_hbm [thread:$0]  %s158_s23, 256, %s312_s3, [#allocation4], %s275_s0, %s275_s0, %s276_s2  }
  0xfa   :  { %267 = dma.done.wait [#allocation4], 256  }
  0xfb   :  { %268 = vsyncadd [#allocation4], 4294967040 }
  0xfc   :  { %167 = vsyncpa [#allocation3], 1 }
  0xfd   :  { %168 = vsyncpa [#allocation4], 1 }

</bundles_post_ra>
